<compile_context>
chip_gen: v7x
topology: tpu7x:2x2x1
jax: 0.10.0
libtpu: 0.0.40
codegen_flags: <defaults>
</compile_context>

<pallas_src>
import functools

import jax
import jax.numpy as jnp
from jax.experimental import pallas as pl
from jax.experimental.pallas import tpu as pltpu


def _twa_kernel(x_ref, w1t_ref, b1_ref, w2_ref, gamma_ref, out_ref, *, t_valid):
    # x_ref:     (Bb, Tp, H)  one block of batch rows (Tp % 8 == 0)
    # w1t_ref:   (H, H)       fc_1.weight.T  (whole array resident in VMEM)
    # b1_ref:    (1, H)       fc_1.bias
    # w2_ref:    (1, H)       fc_2.weight row (no bias)
    # gamma_ref: (1,)         scalar in SMEM
    # out_ref:   (Bb, H)
    Bb, Tp, H = x_ref.shape
    x = x_ref[...]                                       # native dtype, no upcast

    # ---- fc_1 + tanh on the MXU, M = Bb*Tp (reshape is a free view: Tp%8==0) ----
    x2d = x.reshape(Bb * Tp, H)
    h2d = jnp.tanh(
        jnp.dot(x2d, w1t_ref[...], preferred_element_type=jnp.float32)
        + b1_ref[...].astype(jnp.float32)
    )                                                    # (Bb*Tp, H) f32
    h = h2d.reshape(Bb, Tp, H)

    # ---- fc_2 (N=1): VPU multiply + lane reduce -> scores (Bb, Tp) ----
    scores = jnp.sum(h * w2_ref[...].astype(jnp.float32), axis=-1)

    # ---- mask padded time steps (static condition) before softmax ----
    if t_valid != Tp:
        t_ids = jax.lax.broadcasted_iota(jnp.int32, (Bb, Tp), 1)
        scores = jnp.where(t_ids < t_valid, scores, -1e30)

    # ---- softmax over the time axis (lanes), f32 stats ----
    m = jnp.max(scores, axis=-1, keepdims=True)          # (Bb, 1)
    p = jnp.exp(scores - m)                              # (Bb, Tp)
    denom = jnp.sum(p, axis=-1, keepdims=True)           # (Bb, 1)
    w_att = p * pl.reciprocal(denom, approx=True)        # (Bb, Tp) f32

    # ---- weighted temporal aggregation (product promotes to f32) ----
    context = jnp.sum(w_att[:, :, None] * x, axis=1)     # (Bb, H) f32

    # ---- residual with last *valid* time step, scaled by gamma (SMEM scalar) ----
    gamma = gamma_ref[0]
    last = x[:, t_valid - 1, :].astype(jnp.float32)      # (Bb, H)
    out_ref[...] = (last + gamma * context).astype(out_ref.dtype)


def _round_up(n, m):
    return ((n + m - 1) // m) * m


def temporal_weighted_aggregation(x, w1, b1, w2, gamma, *, block_b=None):
    """x: (B, T, H).  w1: (H, H) [fc_1.weight, (out,in)].  b1: (H,).
    w2: (1, H) [fc_2.weight, no bias].  gamma: scalar."""
    B, T, H = x.shape
    out_dtype = x.dtype
    cdt = x.dtype                       # native compute dtype for MXU operands

    # Pad T to a multiple of 8 so in-kernel reshapes are layout-preserving.
    Tp = _round_up(T, 8)
    if Tp != T:
        x = jnp.pad(x, ((0, 0), (0, Tp - T), (0, 0)))

    # block_b: multiple of 8, M = block_b*Tp ~ 512, >= 2 grid steps if possible.
    if block_b is None:
        block_b = max(8, ((512 // Tp) // 8) * 8)
    block_b = max(8, (block_b // 8) * 8)
    b_pad8 = _round_up(B, 8)
    block_b = min(block_b, b_pad8)
    if b_pad8 >= 16 and b_pad8 // block_b < 2:
        block_b = max(8, ((b_pad8 // 2) // 8) * 8)   # let both v7x TCs work
    Bp = _round_up(B, block_b)
    if Bp != B:
        # Zero-padded batch rows produce finite values and are sliced off below.
        x = jnp.pad(x, ((0, Bp - B), (0, 0), (0, 0)))

    w1t = jnp.asarray(w1, cdt).T                      # (H, H), native dtype
    b1_row = jnp.asarray(b1, cdt).reshape(1, H)       # (1, H)
    w2_row = jnp.asarray(w2, cdt).reshape(1, H)       # (1, H)
    gamma_s = jnp.asarray(gamma, jnp.float32).reshape(1)   # (1,) -> SMEM

    # VMEM budget: double-buffered x/out blocks + resident weights + f32 temps.
    isz = jnp.dtype(cdt).itemsize
    osz = jnp.dtype(out_dtype).itemsize
    x_blk = block_b * Tp * H * isz
    out_blk = block_b * H * osz
    w_res = (H * H + 2 * H) * isz
    f32_tmp = 2 * block_b * Tp * H * 4
    need = 2 * x_blk + 2 * out_blk + w_res + f32_tmp
    vmem_limit = int(min(64 * 1024 * 1024, max(8 * 1024 * 1024, 2 * need)))

    grid = (Bp // block_b,)
    kernel = functools.partial(_twa_kernel, t_valid=T)

    out = pl.pallas_call(
        kernel,
        out_shape=jax.ShapeDtypeStruct((Bp, H), out_dtype),
        grid_spec=pltpu.PrefetchScalarGridSpec(
            num_scalar_prefetch=0,
            grid=grid,
            in_specs=[
                pl.BlockSpec((block_b, Tp, H), lambda i: (i, 0, 0)),   # x block
                pl.BlockSpec(memory_space=pltpu.MemorySpace.VMEM),     # W1.T resident
                pl.BlockSpec(memory_space=pltpu.MemorySpace.VMEM),     # b1 resident
                pl.BlockSpec(memory_space=pltpu.MemorySpace.VMEM),     # w2 resident
                pl.BlockSpec(memory_space=pltpu.MemorySpace.SMEM),     # gamma scalar
            ],
            out_specs=pl.BlockSpec((block_b, H), lambda i: (i, 0)),
        ),
        compiler_params=pltpu.CompilerParams(
            dimension_semantics=("parallel",),   # batch axis shards across TCs
            vmem_limit_bytes=vmem_limit,
        ),
    )(x, w1t, b1_row, w2_row, gamma_s)

    return out[:B]


def _reference(x, w1, b1, w2, gamma):
    # plain-JAX reference matching the PyTorch forward
    out = jnp.tanh(jnp.einsum("bth,oh->bto", x, w1) + b1)     # (B,T,H)
    scores = jnp.einsum("bth,oh->bto", out, w2)[..., 0]       # (B,T)
    w_att = jax.nn.softmax(scores, axis=1)[..., None]         # (B,T,1)
    context = jnp.sum(w_att * x, axis=1)                      # (B,H)
    return x[:, -1, :] + gamma * context


if __name__ == "__main__":
    key = jax.random.PRNGKey(0)
    kx, kw1, kb1, kw2, kx2 = jax.random.split(key, 5)

    # --- main case (module-implied small shapes): B=2, T=8, H=32 ---
    B, T, H = 2, 8, 32
    x = jax.random.normal(kx, (B, T, H), dtype=jnp.float32)
    w1 = jax.random.normal(kw1, (H, H), dtype=jnp.float32) * 0.1   # fc_1.weight (out,in)
    b1 = jax.random.normal(kb1, (H,), dtype=jnp.float32) * 0.1     # fc_1.bias
    w2 = jax.random.normal(kw2, (1, H), dtype=jnp.float32) * 0.1   # fc_2.weight (no bias)
    gamma = jnp.float32(0.3)

    out = temporal_weighted_aggregation(x, w1, b1, w2, gamma)
    out = jax.block_until_ready(out)
    ref = _reference(x, w1, b1, w2, gamma)
    assert out.shape == (B, H)
    # Tolerance accounts for the EUP approximate reciprocal in the softmax.
    assert jnp.allclose(out, ref, atol=2e-3, rtol=2e-3), "mismatch vs reference (case 1)"

    # --- second case exercising T-padding mask, batch padding, multi-step grid ---
    B2, T2 = 20, 5
    x2 = jax.random.normal(kx2, (B2, T2, H), dtype=jnp.float32)
    out2 = temporal_weighted_aggregation(x2, w1, b1, w2, gamma)
    out2 = jax.block_until_ready(out2)
    ref2 = _reference(x2, w1, b1, w2, gamma)
    assert out2.shape == (B2, H)
    assert jnp.allclose(out2, ref2, atol=2e-3, rtol=2e-3), "mismatch vs reference (case 2)"

    print("KERNEL_OK")
</pallas_src>

<mosaic_0001>
module attributes {stable_mosaic.version = 11 : i64} {
  func.func @_twa_kernel(%arg0: i32, %arg1: memref<8x8x32xf32, #tpu.memory_space<vmem>>, %arg2: memref<32x32xf32, #tpu.memory_space<vmem>>, %arg3: memref<1x32xf32, #tpu.memory_space<vmem>>, %arg4: memref<1x32xf32, #tpu.memory_space<vmem>>, %arg5: memref<1xf32, #tpu.memory_space<smem>>, %arg6: memref<8x32xf32, #tpu.memory_space<vmem>>) attributes {dimension_semantics = [#tpu.dimension_semantics<parallel>], iteration_bounds = array<i64: 1>, scalar_prefetch = 0 : i64, scratch_operands = 0 : i64, tpu.core_type = #tpu.core_type<tc>, window_params = [{transform_indices = @transform_0, window_bounds = array<i64: 8, 8, 32>}, {pipeline_mode = #tpu.pipeline_mode<synchronous>, transform_indices = @transform_1, window_bounds = array<i64: 32, 32>}, {pipeline_mode = #tpu.pipeline_mode<synchronous>, transform_indices = @transform_2, window_bounds = array<i64: 1, 32>}, {pipeline_mode = #tpu.pipeline_mode<synchronous>, transform_indices = @transform_3, window_bounds = array<i64: 1, 32>}, {transform_indices = @transform_4, window_bounds = array<i64: 1>}, {transform_indices = @transform_5, window_bounds = array<i64: 8, 32>}]} {
    %c0 = arith.constant 0 : index
    %c0_0 = arith.constant 0 : index
    %c0_1 = arith.constant 0 : index
    %0 = vector.load %arg1[%c0, %c0_0, %c0_1] : memref<8x8x32xf32, #tpu.memory_space<vmem>>, vector<8x8x32xf32>
    %1 = vector.shape_cast %0 : vector<8x8x32xf32> to vector<64x32xf32>
    %c0_2 = arith.constant 0 : index
    %c0_3 = arith.constant 0 : index
    %2 = vector.load %arg2[%c0_2, %c0_3] : memref<32x32xf32, #tpu.memory_space<vmem>>, vector<32x32xf32>
    %cst = arith.constant dense<0.000000e+00> : vector<64x32xf32>
    %3 = tpu.matmul %1, %2, %cst {dimension_numbers = #tpu.dot_dimension_numbers<[1], [0], [0], [1], [0, 0, 1, 1], [], []>} : vector<64x32xf32>, vector<32x32xf32>, vector<64x32xf32> -> vector<64x32xf32>
    %c0_4 = arith.constant 0 : index
    %c0_5 = arith.constant 0 : index
    %4 = vector.load %arg3[%c0_4, %c0_5] : memref<1x32xf32, #tpu.memory_space<vmem>>, vector<1x32xf32>
    %5 = vector.broadcast %4 : vector<1x32xf32> to vector<64x32xf32>
    %6 = arith.addf %3, %5 : vector<64x32xf32>
    %7 = math.tanh %6 : vector<64x32xf32>
    %8 = vector.shape_cast %7 : vector<64x32xf32> to vector<8x8x32xf32>
    %c0_6 = arith.constant 0 : index
    %c0_7 = arith.constant 0 : index
    %9 = vector.load %arg4[%c0_6, %c0_7] : memref<1x32xf32, #tpu.memory_space<vmem>>, vector<1x32xf32>
    %10 = vector.shape_cast %9 : vector<1x32xf32> to vector<1x1x32xf32>
    %11 = vector.broadcast %10 : vector<1x1x32xf32> to vector<8x8x32xf32>
    %12 = arith.mulf %8, %11 : vector<8x8x32xf32>
    %cst_8 = arith.constant dense<0.000000e+00> : vector<8x8xf32>
    %13 = vector.multi_reduction <add>, %12, %cst_8 [2] : vector<8x8x32xf32> to vector<8x8xf32>
    %cst_9 = arith.constant dense<0xFF800000> : vector<8xf32>
    %14 = vector.multi_reduction <maximumf>, %13, %cst_9 [1] : vector<8x8xf32> to vector<8xf32>
    %15 = vector.shape_cast %14 : vector<8xf32> to vector<8x1xf32>
    %16 = vector.broadcast %15 : vector<8x1xf32> to vector<8x8xf32>
    %17 = arith.subf %13, %16 : vector<8x8xf32>
    %18 = math.exp %17 : vector<8x8xf32>
    %cst_10 = arith.constant dense<0.000000e+00> : vector<8xf32>
    %19 = vector.multi_reduction <add>, %18, %cst_10 [1] : vector<8x8xf32> to vector<8xf32>
    %20 = vector.shape_cast %19 : vector<8xf32> to vector<8x1xf32>
    %21 = tpu.reciprocal %20 {approx = true} : vector<8x1xf32> -> vector<8x1xf32>
    %22 = vector.broadcast %21 : vector<8x1xf32> to vector<8x8xf32>
    %23 = arith.mulf %18, %22 : vector<8x8xf32>
    %24 = vector.shape_cast %23 : vector<8x8xf32> to vector<8x8x1xf32>
    %25 = vector.broadcast %24 : vector<8x8x1xf32> to vector<8x8x32xf32>
    %26 = arith.mulf %25, %0 : vector<8x8x32xf32>
    %cst_11 = arith.constant dense<0.000000e+00> : vector<8x32xf32>
    %27 = vector.multi_reduction <add>, %26, %cst_11 [1] : vector<8x8x32xf32> to vector<8x32xf32>
    %c0_12 = arith.constant 0 : index
    %28 = memref.load %arg5[%c0_12] : memref<1xf32, #tpu.memory_space<smem>>
    %29 = vector.extract_strided_slice %0 {offsets = [0, 7, 0], sizes = [8, 1, 32], strides = [1, 1, 1]} : vector<8x8x32xf32> to vector<8x1x32xf32>
    %30 = vector.shape_cast %29 : vector<8x1x32xf32> to vector<8x32xf32>
    %31 = vector.broadcast %28 : f32 to vector<8x32xf32>
    %32 = arith.mulf %31, %27 : vector<8x32xf32>
    %33 = arith.addf %30, %32 : vector<8x32xf32>
    %c0_13 = arith.constant 0 : index
    %c0_14 = arith.constant 0 : index
    %34 = vector.load %arg6[%c0_13, %c0_14] : memref<8x32xf32, #tpu.memory_space<vmem>>, vector<8x32xf32>
    tpu.vector_store %arg6[%c0_13, %c0_14], %33 {strides = array<i32>} : memref<8x32xf32, #tpu.memory_space<vmem>>, vector<8x32xf32>,
    return
  }
  func.func @transform_0(%arg0: i32) -> (i32, i32, i32) {
    %c0_i32 = arith.constant 0 : i32
    %c0_i32_0 = arith.constant 0 : i32
    %c0_i32_1 = arith.constant 0 : i32
    return %arg0, %c0_i32, %c0_i32_0 : i32, i32, i32
  }
  func.func @transform_1(%arg0: i32) -> (i32, i32) {
    %c0_i32 = arith.constant 0 : i32
    %c0_i32_0 = arith.constant 0 : i32
    %c0_i32_1 = arith.constant 0 : i32
    return %c0_i32, %c0_i32_0 : i32, i32
  }
  func.func @transform_2(%arg0: i32) -> (i32, i32) {
    %c0_i32 = arith.constant 0 : i32
    %c0_i32_0 = arith.constant 0 : i32
    %c0_i32_1 = arith.constant 0 : i32
    return %c0_i32, %c0_i32_0 : i32, i32
  }
  func.func @transform_3(%arg0: i32) -> (i32, i32) {
    %c0_i32 = arith.constant 0 : i32
    %c0_i32_0 = arith.constant 0 : i32
    %c0_i32_1 = arith.constant 0 : i32
    return %c0_i32, %c0_i32_0 : i32, i32
  }
  func.func @transform_4(%arg0: i32) -> i32 {
    %c0_i32 = arith.constant 0 : i32
    %c0_i32_0 = arith.constant 0 : i32
    return %c0_i32 : i32
  }
  func.func @transform_5(%arg0: i32) -> (i32, i32) {
    %c0_i32 = arith.constant 0 : i32
    %c0_i32_0 = arith.constant 0 : i32
    return %arg0, %c0_i32 : i32, i32
  }
}

</mosaic_0001>

<bundles_post_ra>
// kernel: tpu_custom_call.1
= control target key start
LH: loop header
LB: loop body
LE: loop exit
PB: predicated region body
PF: predicated region fallthrough
CT: control target
= control target key end

     0   :  { %11 = vsyncpa [#allocation4], 0  ;;  %s1062_s0 = inlined_call_operand.hbm [shape: f32[8,8,32], index: 0, kind: input, shape index: {}]   ;;  %s1063_s1 = inlined_call_operand.hbm [shape: f32[32,32], index: 1, kind: input, shape index: {}]   ;;  %s1064_s2 = inlined_call_operand.vmem [shape: f32[1,32], index: 2, kind: input, shape index: {}]   ;;  %s1065_s3 = inlined_call_operand.vmem [shape: f32[1,32], index: 3, kind: input, shape index: {}]   ;;  %s1066_s4 = inlined_call_operand.<no memory space> [shape: f32[1], index: 4, kind: input, shape index: {}]   ;;  %s1067_s5 = inlined_call_operand.hbm [shape: f32[8,32], index: 5, kind: output, shape index: {}]  }
   0x1   :  { %12 = vsyncpa [#allocation7], 0 }
   0x2   :  { %13 = vsyncpa [#allocation5], 0  ;;  %s830_s18 = smov [#allocation3]   ;;  %s758_s22 = scalar_lea.hbm %s1062_s0, 1024 }
   0x3   :  { %s19_s19 = sshll.u32 %s830_s18, 4  ;;  %p759_p0 = scmp.ne.s32.totalorder %s1062_s0, %s758_s22  ;;  %s20_s19 = int_to_ptr.vmem [resolvable:$true] %s19_s19 }
   0x4   :  { %p762_p1 = scmp.lt.u32.totalorder %s758_s22, %s1062_s0 }
   0x6   :  { %p764_p2 = pnand %p762_p1, %p759_p0 }
   0x8   :  { %767 = shalt.err (!%p764_p2)
}
   0x9   :  { %s768_s27 = scalar_lea.vmem %s20_s19, 1024  ;;  %p773_p4 = scmp.lt.s32.totalorder %s20_s19, %s20_s19 }
   0xa   :  { %p769_p3 = scmp.ne.s32.totalorder %s20_s19, %s768_s27  ;;  %p774_p5 = scmp.lt.s32.totalorder %s768_s27, %s768_s27 }
   0xc   :  { %p775_p6 = por %p774_p5, %p773_p4 }
   0xe   :  { %p776_p7 = pnand %p775_p6, %p769_p3 }
  0x10   :  { %779 = shalt.err (!%p776_p7)
}
  0x11   :  { %s831_s28 = smov 128   ;;  %s832_s29 = smov 8  }
  0x12   :  { %25 = dma.hbm_to_vmem [thread:$0]  %s1062_s0, 1024, %s20_s19, [#allocation4], %s831_s28, %s831_s28, %s832_s29  }
  0x13   :  { %s833_s7 = smov [#allocation6]   ;;  %s780_s11 = scalar_lea.hbm %s1063_s1, 512 }
  0x14   :  { %s31_s8 = sshll.u32 %s833_s7, 4  ;;  %p781_p8 = scmp.ne.s32.totalorder %s1063_s1, %s780_s11  ;;  %s32_s8 = int_to_ptr.vmem [resolvable:$true] %s31_s8 }
  0x15   :  { %p784_p9 = scmp.lt.u32.totalorder %s780_s11, %s1063_s1 }
  0x17   :  { %p786_p10 = pnand %p784_p9, %p781_p8 }
  0x19   :  { %789 = shalt.err (!%p786_p10)
}
  0x1a   :  { %s790_s16 = scalar_lea.vmem %s32_s8, 512  ;;  %p795_p12 = scmp.lt.s32.totalorder %s32_s8, %s32_s8 }
  0x1b   :  { %p791_p11 = scmp.ne.s32.totalorder %s32_s8, %s790_s16  ;;  %p796_p13 = scmp.lt.s32.totalorder %s790_s16, %s790_s16 }
  0x1d   :  { %p797_p0 = por %p796_p13, %p795_p12 }
  0x1f   :  { %p798_p1 = pnand %p797_p0, %p791_p11 }
  0x21   :  { %801 = shalt.err (!%p798_p1)
}
  0x22   :  { %37 = dma.hbm_to_vmem [thread:$0]  %s1063_s1, 512, %s32_s8, [#allocation7], %s831_s28, %s831_s28, %s832_s29  }
  0x23   :  { %824 = dma.done.wait [#allocation4], 1024  }
  0x24   :  { %825 = vsyncadd [#allocation4], 4294966272 }
  0x25   :  { %826 = dma.done.wait [#allocation7], 512  }
  0x26   :  { %827 = vsyncadd [#allocation7], 4294966784  ;;  %vm69_vm0 = vcmask 261120   ;;  %v58_v0 = vld [vmem:[#allocation6] sm:$0xff]  ;;  %v59_v1 = vld [vmem:[#allocation6 + $0x8] sm:$0xff]  ;;  %v254_v56 = vlaneseq  ;;  %vm288_vm1 = vcmask 1041409  }
  0x27   :  { %v60_v2 = vld [vmem:[#allocation6 + $0x10] sm:$0xff]  ;;  %v704_v3 = vpack.c.bf16 %v59_v1, %v58_v0  ;;  %v61_v4 = vld [vmem:[#allocation6 + $0x18] sm:$0xff]  ;;  %v890_v5 = vld [vmem:[#allocation3] sm:$0xff]  ;;  %vm290_vm2 = vcmask 1042434   ;;  %vm292_vm3 = vcmask 1043459   ;;  %vm294_vm4 = vcmask 1044484  }
  0x28   :  { %v708_v6 = vpack.c.bf16 %v61_v4, %v60_v2  ;;  %692 = vmatprep.mubr.msk.f32.mxu0 %vm69_vm0, %v890_v5  ;;  %v894_v7 = vld [vmem:[#allocation3 + $0x20] sm:$0xff]  ;;  %v898_v8 = vld [vmem:[#allocation3 + $0x8] sm:$0xff]  ;;  %v902_v10 = vld [vmem:[#allocation3 + $0x10] sm:$0xff]  ;;  %v255_v57 = vand.u32 127, %v254_v56  ;;  %v936_v58 = vshrl.u32 %v254_v56, 7  ;;  %vm296_vm5 = vcmask 1045509  }
  0x29   :  { %705 = vmatprep.subr.bf16.mxu0 %v704_v3  ;;  %712 = vmatprep.subr.bf16.mxu1 %v704_v3  ;;  %v900_v9 = vld [vmem:[#allocation3 + $0x28] sm:$0xff]  ;;  %v904_v11 = vld [vmem:[#allocation3 + $0x30] sm:$0xff]  ;;  %v912_v12 = vld [vmem:[#allocation3 + $0x18] sm:$0xff]  ;;  %vm298_vm6 = vcmask 1046534   ;;  %vm300_vm7 = vcmask 1047559   ;;  %vm303_vm8 = vcmask 64512  }
  0x2a   :  { %707 = vmatpush3.bf16.msra.mxu0 %v704_v3  ;;  %714 = vmatpush3.bf16.msra.mxu1 %v704_v3  ;;  %v916_v13 = vld [vmem:[#allocation3 + $0x38] sm:$0xff]  ;;  %v662_v14 = vld [vmem:[%s1064_s2] ss:$0 sm:$0xff]  ;;  %v939_v60 = vsub.s32 %v255_v57, %v936_v58  ;;  %vm644_vm9 = vcmask 260096   ;;  %vm642_vm10 = vcmask 261127  }
  0x2b   :  { %709 = vmatprep.subr.bf16.mxu0 %v708_v6  ;;  %713 = vmatprep.subr.bf16.mxu1 %v708_v6  ;;  %v671_v31 = vld [vmem:[%s1065_s3] ss:$0 sm:$0xff] }
  0x2c   :  { %698 = vmatprep.mubr.msk.f32.mxu1 %vm69_vm0, %v894_v7 }
  0x2e   :  { %711 = vmatpush3.bf16.msra.mxu0 %v708_v6  ;;  %715 = vmatpush3.bf16.msra.mxu1 %v708_v6 }
  0x31   :  { %693 = vmatmul.mubr.msk.f32.vlgmr.msra.gmra.mrb[0].mxu0 %vm69_vm0, %v898_v8  ;;  %699 = vmatmul.mubr.msk.f32.vlgmr.msra.gmra.mrb[0].mxu1 %vm69_vm0, %v900_v9 }
  0x32   :  { %695 = vmatprep.mubr.msk.f32.mxu0 %vm69_vm0, %v902_v10  ;;  %701 = vmatprep.mubr.msk.f32.mxu1 %vm69_vm0, %v904_v11 }
  0x35   :  { %696 = vmatmul.mubr.msk.f32.gmra.mrb[2].mxu0 %vm69_vm0, %v912_v12  ;;  %702 = vmatmul.mubr.msk.f32.gmra.mrb[2].mxu1 %vm69_vm0, %v916_v13 }
 0x104   :  { %v694_v15 = vpop.f32.mrb[0].mxu0  ;;  %v700_v16 = vpop.f32.mrb[0].mxu1 }
 0x105   :  { %v166_v17 = vadd.f32 %v694_v15, %v662_v14  ;;  %v160_v18 = vpop.f32.mrb[1].mxu0  ;;  %v180_v19 = vpop.f32.mrb[1].mxu1  ;;  %v186_v29 = vadd.f32 %v700_v16, %v662_v14 }
 0x106   :  { %v161_v20 = vadd.f32 %v662_v14, %v160_v18  ;;  %v181_v21 = vadd.f32 %v662_v14, %v180_v19 }
 0x107   :  { %724 = vtanh.f32 %v166_v17 }
 0x108   :  { %726 = vtanh.f32 %v161_v20  ;;  %v697_v22 = vpop.f32.mrb[2].mxu0  ;;  %v703_v23 = vpop.f32.mrb[2].mxu1 }
 0x109   :  { %v176_v24 = vadd.f32 %v697_v22, %v662_v14  ;;  %v170_v25 = vpop.f32.mrb[3].mxu0  ;;  %v190_v26 = vpop.f32.mrb[3].mxu1  ;;  %728 = vtanh.f32 %v181_v21  ;;  %v196_v30 = vadd.f32 %v703_v23, %v662_v14 }
 0x10a   :  { %v171_v27 = vadd.f32 %v662_v14, %v170_v25  ;;  %v191_v28 = vadd.f32 %v662_v14, %v190_v26 }
 0x10b   :  { %730 = vtanh.f32 %v176_v24 }
 0x10c   :  { %732 = vtanh.f32 %v171_v27 }
 0x10d   :  { %734 = vtanh.f32 %v191_v28  ;;  %v834_v28 = vmov 0  }
 0x10e   :  { %736 = vtanh.f32 %v186_v29  ;;  %723 = vset.pattern.permute.xlu0 %v834_v28  ;;  %722 = vset.pattern.permute.xlu1 %v834_v28  ;;  %v310_v29 = vsub.s32 0, %v936_v58 }
 0x10f   :  { %738 = vtanh.f32 %v196_v30  ;;  %v314_v30 = vsub.s32 1, %v936_v58 }
 0x111   :  { %v725_v32 = vpop.eup %724 }
 0x112   :  { %v727_v33 = vpop.eup %726  ;;  %v215_v34 = vmul.f32 %v725_v32, %v671_v31  ;;  %v322_v32 = vsub.s32 3, %v936_v58 }
 0x113   :  { %v729_v35 = vpop.eup %728  ;;  %v214_v37 = vmul.f32 %v727_v33, %v671_v31 }
 0x114   :  { %v225_v36 = vsel %vm69_vm0, %v215_v34, 0.0  ;;  %v218_v41 = vmul.f32 %v729_v35, %v671_v31 }
 0x115   :  { %v731_v38 = vpop.eup %730  ;;  %226 = vadd.xlane.f32.xlu0 %v225_v36  ;;  %v222_v44 = vsel %vm69_vm0, %v214_v37, 0.0  ;;  %v326_v37 = vsub.s32 4, %v936_v58 }
 0x116   :  { %v733_v39 = vpop.eup %732  ;;  %v217_v40 = vmul.f32 %v731_v38, %v671_v31  ;;  %v234_v47 = vsel %vm69_vm0, %v218_v41, 0.0 }
 0x117   :  { %v735_v42 = vpop.eup %734  ;;  %v216_v45 = vmul.f32 %v733_v39, %v671_v31 }
 0x118   :  { %v231_v43 = vsel %vm69_vm0, %v217_v40, 0.0  ;;  %v737_v46 = vpop.eup %736  ;;  %v220_v48 = vmul.f32 %v735_v42, %v671_v31 }
 0x119   :  { %232 = vadd.xlane.f32.xlu1 %v231_v43  ;;  %223 = vadd.xlane.f32.xlu0 %v222_v44  ;;  %v228_v49 = vsel %vm69_vm0, %v216_v45, 0.0  ;;  %v219_v50 = vmul.f32 %v737_v46, %v671_v31  ;;  %v739_v51 = vpop.eup %738  ;;  %v330_v44 = vsub.s32 5, %v936_v58 }
 0x11a   :  { %v240_v52 = vsel %vm69_vm0, %v220_v48, 0.0  ;;  %v221_v54 = vmul.f32 %v739_v51, %v671_v31  ;;  %v318_v31 = vsub.s32 2, %v936_v58  ;;  %v334_v48 = vsub.s32 6, %v936_v58 }
 0x11b   :  { %v237_v53 = vsel %vm69_vm0, %v219_v50, 0.0 }
 0x11c   :  { %v243_v55 = vsel %vm69_vm0, %v221_v54, 0.0 }
 0x11d   :  { %229 = vadd.xlane.f32.xlu1 %v228_v49  ;;  %235 = vadd.xlane.f32.xlu0 %v234_v47 }
 0x121   :  { %238 = vadd.xlane.f32.xlu1 %v237_v53  ;;  %241 = vadd.xlane.f32.xlu0 %v240_v52  ;;  %v338_v52 = vsub.s32 7, %v936_v58 }
 0x125   :  { %244 = vadd.xlane.f32.xlu1 %v243_v55 }
 0x1a2   :  { %v227_v59 = vpop.xlane.xlu0 %226 }
 0x1a3   :  { %v263_v0 = vrot.slane %v227_v59, %v939_v60 }
 0x1a6   :  { %v233_v61 = vpop.xlane.xlu1 %232  ;;  %v224_v62 = vpop.xlane.xlu0 %223 }
 0x1a7   :  { %v259_v63 = vrot.slane %v224_v62, %v939_v60  ;;  %v271_v6 = vrot.slane %v233_v61, %v939_v60 }
 0x1a9   :  { %v289_v14 = vsel %vm288_vm1, %v263_v0, %v259_v63 }
 0x1aa   :  { %v230_v1 = vpop.xlane.xlu1 %229  ;;  %v236_v2 = vpop.xlane.xlu0 %235 }
 0x1ab   :  { %v267_v3 = vrot.slane %v230_v1, %v939_v60  ;;  %v275_v4 = vrot.slane %v236_v2, %v939_v60 }
 0x1ad   :  { %v291_v15 = vsel %vm290_vm2, %v267_v3, %v289_v14 }
 0x1ae   :  { %v293_v16 = vsel %vm292_vm3, %v271_v6, %v291_v15  ;;  %v239_v17 = vpop.xlane.xlu1 %238  ;;  %v242_v18 = vpop.xlane.xlu0 %241 }
 0x1af   :  { %v295_v19 = vsel %vm294_vm4, %v275_v4, %v293_v16  ;;  %v279_v20 = vrot.slane %v239_v17, %v939_v60  ;;  %v283_v21 = vrot.slane %v242_v18, %v939_v60 }
 0x1b1   :  { %v297_v22 = vsel %vm296_vm5, %v279_v20, %v295_v19 }
 0x1b2   :  { %v245_v23 = vpop.xlane.xlu1 %244  ;;  %v299_v25 = vsel %vm298_vm6, %v283_v21, %v297_v22 }
 0x1b3   :  { %v287_v24 = vrot.slane %v245_v23, %v939_v60 }
 0x1b5   :  { %v301_v26 = vsel %vm300_vm7, %v287_v24, %v299_v25 }
 0x1b6   :  { %v304_v27 = vsel %vm303_vm8, %v301_v26, -inf }
 0x1b7   :  { %305 = vmax.xlane.f32.xlu0 %v304_v27 }
 0x244   :  { %v306_v33 = vpop.xlane.xlu0 %305 }
 0x245   :  { %v311_v34 = vrot.slane %v306_v33, %v310_v29  ;;  %v315_v35 = vrot.slane %v306_v33, %v314_v30  ;;  %v319_v36 = vrot.slane %v306_v33, %v318_v31  ;;  %v323_v38 = vrot.slane %v306_v33, %v322_v32 }
 0x246   :  { %v327_v45 = vrot.slane %v306_v33, %v326_v37  ;;  %v331_v49 = vrot.slane %v306_v33, %v330_v44  ;;  %v335_v53 = vrot.slane %v306_v33, %v334_v48 }
 0x247   :  { %v348_v39 = vsub.f32 %v224_v62, %v311_v34  ;;  %v349_v40 = vsub.f32 %v227_v59, %v315_v35  ;;  %v350_v41 = vsub.f32 %v230_v1, %v319_v36  ;;  %v351_v46 = vsub.f32 %v233_v61, %v323_v38 }
 0x248   :  { %v352_v50 = vsub.f32 %v236_v2, %v327_v45  ;;  %v353_v54 = vsub.f32 %v239_v17, %v331_v49  ;;  %v339_v59 = vrot.slane %v306_v33, %v338_v52  ;;  %v354_v61 = vsub.f32 %v242_v18, %v335_v53 }
 0x249   :  { %v356_v42 = vmul.f32 1.442695, %v348_v39  ;;  %v358_v43 = vmul.f32 1.442695, %v349_v40  ;;  %v360_v47 = vmul.f32 1.442695, %v350_v41 }
 0x24a   :  { %v362_v51 = vmul.f32 1.442695, %v351_v46  ;;  %v364_v55 = vmul.f32 1.442695, %v352_v50  ;;  %v366_v62 = vmul.f32 1.442695, %v353_v54  ;;  %v355_v0 = vsub.f32 %v245_v23, %v339_v59 }
 0x24b   :  { %740 = vpow2.f32 %v356_v42  ;;  %v368_v1 = vmul.f32 1.442695, %v354_v61 }
 0x24c   :  { %742 = vpow2.f32 %v358_v43  ;;  %v370_v3 = vmul.f32 1.442695, %v355_v0 }
 0x24d   :  { %744 = vpow2.f32 %v360_v47 }
 0x24e   :  { %746 = vpow2.f32 %v362_v51 }
 0x24f   :  { %748 = vpow2.f32 %v364_v55 }
 0x250   :  { %750 = vpow2.f32 %v366_v62 }
 0x251   :  { %752 = vpow2.f32 %v368_v1 }
 0x252   :  { %754 = vpow2.f32 %v370_v3 }
 0x255   :  { %v979_v56 = vpop.eup %740 }
 0x256   :  { %v743_v57 = vpop.eup %742  ;;  %381 = vperm.xlu1 %722, %v979_v56  }
 0x257   :  { %384 = vperm.xlu0 %723, %v743_v57   ;;  %v745_v63 = vpop.eup %744 }
 0x258   :  { %v747_v2 = vpop.eup %746 }
 0x259   :  { %v749_v4 = vpop.eup %748 }
 0x25a   :  { %387 = vperm.xlu1 %722, %v745_v63   ;;  %v751_v6 = vpop.eup %750 }
 0x25b   :  { %v753_v14 = vpop.eup %752 }
 0x25c   :  { %v755_v15 = vpop.eup %754 }
 0x25e   :  { %390 = vperm.xlu1 %722, %v747_v2  }
 0x262   :  { %393 = vperm.xlu1 %722, %v749_v4  }
 0x266   :  { %396 = vperm.xlu1 %722, %v751_v6  }
 0x26a   :  { %399 = vperm.xlu1 %722, %v753_v14  }
 0x26e   :  { %402 = vperm.xlu1 %722, %v755_v15  }
 0x2d5   :  { %v382_v16 = vpop.permute.xlu1 %381 }
 0x2d6   :  { %v385_v20 = vpop.permute.xlu0 %384  ;;  %v407_v23 = vrot.slane %v382_v16, %v939_v60 }
 0x2d7   :  { %v411_v22 = vrot.slane %v385_v20, %v939_v60 }
 0x2d9   :  { %v388_v17 = vpop.permute.xlu1 %387  ;;  %v436_v28 = vsel %vm288_vm1, %v411_v22, %v407_v23 }
 0x2da   :  { %v415_v24 = vrot.slane %v388_v17, %v939_v60 }
 0x2dc   :  { %v437_v34 = vsel %vm290_vm2, %v415_v24, %v436_v28 }
 0x2dd   :  { %v391_v18 = vpop.permute.xlu1 %390 }
 0x2de   :  { %v419_v25 = vrot.slane %v391_v18, %v939_v60 }
 0x2e0   :  { %v438_v36 = vsel %vm292_vm3, %v419_v25, %v437_v34 }
 0x2e1   :  { %v394_v19 = vpop.permute.xlu1 %393 }
 0x2e2   :  { %v423_v26 = vrot.slane %v394_v19, %v939_v60 }
 0x2e4   :  { %v439_v38 = vsel %vm294_vm4, %v423_v26, %v438_v36 }
 0x2e5   :  { %v397_v21 = vpop.permute.xlu1 %396 }
 0x2e6   :  { %v427_v33 = vrot.slane %v397_v21, %v939_v60 }
 0x2e8   :  { %v440_v40 = vsel %vm296_vm5, %v427_v33, %v439_v38 }
 0x2e9   :  { %v400_v27 = vpop.permute.xlu1 %399 }
 0x2ea   :  { %v431_v35 = vrot.slane %v400_v27, %v939_v60 }
 0x2ec   :  { %v441_v42 = vsel %vm298_vm6, %v431_v35, %v440_v40 }
 0x2ed   :  { %v403_v39 = vpop.permute.xlu1 %402 }
 0x2ee   :  { %v435_v41 = vrot.slane %v403_v39, %v939_v60 }
 0x2f0   :  { %v442_v43 = vsel %vm300_vm7, %v435_v41, %v441_v42 }
 0x2f1   :  { %v444_v45 = vsel %vm303_vm8, %v442_v43, 0.0 }
 0x2f2   :  { %445 = vadd.xlane.f32.xlu1 %v444_v45 }
 0x37f   :  { %v446_v46 = vpop.xlane.xlu1 %445 }
 0x380   :  { %756 = vrcp.f32 %v446_v46 }
 0x38a   :  { %v757_v47 = vpop.eup %756 }
 0x38b   :  { %v456_v49 = vrot.slane %v757_v47, %v314_v30  ;;  %v460_v51 = vrot.slane %v757_v47, %v318_v31  ;;  %v464_v60 = vrot.slane %v757_v47, %v322_v32  ;;  %v468_v55 = vrot.slane %v757_v47, %v326_v37 }
 0x38c   :  { %v472_v61 = vrot.slane %v757_v47, %v330_v44  ;;  %v476_v31 = vrot.slane %v757_v47, %v334_v48  ;;  %v480_v32 = vrot.slane %v757_v47, %v338_v52  ;;  %v452_v37 = vrot.slane %v757_v47, %v310_v29 }
 0x38d   :  { %v490_v50 = vmul.f32 %v743_v57, %v456_v49  ;;  %v491_v53 = vmul.f32 %v745_v63, %v460_v51  ;;  %v492_v54 = vmul.f32 %v747_v2, %v464_v60  ;;  %v493_v59 = vmul.f32 %v749_v4, %v468_v55 }
 0x38e   :  { %v494_v30 = vmul.f32 %v751_v6, %v472_v61  ;;  %v495_v57 = vmul.f32 %v753_v14, %v476_v31  ;;  %v496_v62 = vmul.f32 %v755_v15, %v480_v32  ;;  %v489_v63 = vmul.f32 %v979_v56, %v452_v37 }
 0x38f   :  { %504 = vperm.xlu0 %723, %v490_v50  }
 0x393   :  { %509 = vperm.xlu0 %723, %v491_v53  }
 0x397   :  { %514 = vperm.xlu0 %723, %v492_v54  }
 0x39b   :  { %519 = vperm.xlu0 %723, %v493_v59  }
 0x39f   :  { %524 = vperm.xlu0 %723, %v494_v30  }
 0x3a3   :  { %529 = vperm.xlu0 %723, %v495_v57   ;;  %v602_v57 = vstv %s1066_s4  ;;  %s835_s4 = smov [#allocation8]  }
 0x3a4   :  { %s652_s21 = sshll.u32 %s835_s4, 4  ;;  %s653_s21 = int_to_ptr.vmem [resolvable:$true] %s652_s21 }
 0x3a5   :  { %s802_s22 = scalar_lea.vmem %s653_s21, 128  ;;  %p807_p3 = scmp.lt.s32.totalorder %s653_s21, %s653_s21 }
 0x3a6   :  { %p803_p2 = scmp.ne.s32.totalorder %s653_s21, %s802_s22  ;;  %p808_p4 = scmp.lt.s32.totalorder %s802_s22, %s802_s22 }
 0x3a7   :  { %534 = vperm.xlu0 %723, %v496_v62  }
 0x3a8   :  { %p809_p5 = por %p808_p4, %p807_p3 }
 0x3aa   :  { %p810_p6 = pnand %p809_p5, %p803_p2 }
 0x3ab   :  { %499 = vperm.xlu0 %723, %v489_v63  }
 0x40e   :  { %v505_v44 = vpop.permute.xlu0 %504 }
 0x40f   :  { %v538_v0 = vmul.f32 %v505_v44, %v898_v8 }
 0x411   :  { %v552_v1 = vsel %vm69_vm0, %v538_v0, 0.0 }
 0x412   :  { %v510_v48 = vpop.permute.xlu0 %509  ;;  %v553_v3 = vrot.slane %v552_v1, 4 }
 0x413   :  { %v539_v2 = vmul.f32 %v510_v48, %v902_v10 }
 0x414   :  { %v554_v14 = vadd.f32 %v553_v3, %v552_v1 }
 0x415   :  { %v559_v52 = vsel %vm69_vm0, %v539_v2, 0.0 }
 0x416   :  { %v560_v4 = vrot.slane %v559_v52, 4  ;;  %v515_v6 = vpop.permute.xlu0 %514  ;;  %v555_v20 = vrot.slane %v554_v14, 2 }
 0x417   :  { %v540_v58 = vmul.f32 %v515_v6, %v912_v12 }
 0x418   :  { %v561_v29 = vadd.f32 %v560_v4, %v559_v52  ;;  %v556_v33 = vadd.f32 %v555_v20, %v554_v14 }
 0x419   :  { %v566_v56 = vsel %vm69_vm0, %v540_v58, 0.0 }
 0x41a   :  { %v567_v15 = vrot.slane %v566_v56, 4  ;;  %v520_v16 = vpop.permute.xlu0 %519  ;;  %v562_v17 = vrot.slane %v561_v29, 2  ;;  %v557_v43 = vrot.slane %v556_v33, 1 }
 0x41b   :  { %v541_v18 = vmul.f32 %v520_v16, %v894_v7 }
 0x41c   :  { %v568_v19 = vadd.f32 %v567_v15, %v566_v56  ;;  %v563_v25 = vadd.f32 %v562_v17, %v561_v29  ;;  %v558_v59 = vadd.f32 %v557_v43, %v556_v33 }
 0x41d   :  { %v573_v21 = vsel %vm69_vm0, %v541_v18, 0.0 }
 0x41e   :  { %v569_v22 = vrot.slane %v568_v19, 2  ;;  %v574_v23 = vrot.slane %v573_v21, 4  ;;  %v525_v24 = vpop.permute.xlu0 %524  ;;  %v564_v38 = vrot.slane %v563_v25, 1  ;;  %v604_v3 = vmul.f32 %v602_v57, %v558_v59 }
 0x41f   :  { %v542_v26 = vmul.f32 %v525_v24, %v900_v9 }
 0x420   :  { %v570_v27 = vadd.f32 %v569_v22, %v568_v19  ;;  %v575_v28 = vadd.f32 %v574_v23, %v573_v21  ;;  %v565_v51 = vadd.f32 %v564_v38, %v563_v25  ;;  %v612_v20 = vadd.f32 %v604_v3, %v898_v8 }
 0x421   :  { %v580_v34 = vsel %vm69_vm0, %v542_v26, 0.0 }
 0x422   :  { %v576_v35 = vrot.slane %v575_v28, 2  ;;  %v530_v36 = vpop.permute.xlu0 %529  ;;  %v581_v39 = vrot.slane %v580_v34, 4  ;;  %v571_v41 = vrot.slane %v570_v27, 1  ;;  %v605_v63 = vmul.f32 %v602_v57, %v565_v51 }
 0x423   :  { %v543_v40 = vmul.f32 %v530_v36, %v904_v11 }
 0x424   :  { %v577_v42 = vadd.f32 %v576_v35, %v575_v28  ;;  %v582_v45 = vadd.f32 %v581_v39, %v580_v34  ;;  %v572_v54 = vadd.f32 %v571_v41, %v570_v27  ;;  %v613_v56 = vadd.f32 %v605_v63, %v902_v10 }
 0x425   :  { %v587_v46 = vsel %vm69_vm0, %v543_v40, 0.0  ;;  %v627_v34 = vrot.slane %v612_v20, 7 }
 0x426   :  { %v578_v47 = vrot.slane %v577_v42, 1  ;;  %v588_v49 = vrot.slane %v587_v46, 4  ;;  %v535_v50 = vpop.permute.xlu0 %534  ;;  %v583_v53 = vrot.slane %v582_v45, 2  ;;  %v606_v1 = vmul.f32 %v602_v57, %v572_v54 }
 0x427   :  { %v544_v60 = vmul.f32 %v535_v50, %v916_v13  ;;  %v628_v26 = vrot.slane %v613_v56, 6 }
 0x428   :  { %v589_v55 = vadd.f32 %v588_v49, %v587_v46  ;;  %v579_v61 = vadd.f32 %v578_v47, %v577_v42  ;;  %v584_v30 = vadd.f32 %v583_v53, %v582_v45  ;;  %v614_v16 = vadd.f32 %v606_v1, %v912_v12 }
 0x429   :  { %v594_v31 = vsel %vm69_vm0, %v544_v60, 0.0  ;;  %v629_v8 = vsel %vm288_vm1, %v628_v26, %v627_v34 }
 0x42a   :  { %v590_v32 = vrot.slane %v589_v55, 2  ;;  %v595_v62 = vrot.slane %v594_v31, 4  ;;  %v500_v37 = vpop.permute.xlu0 %499  ;;  %v585_v44 = vrot.slane %v584_v30, 1  ;;  %v607_v52 = vmul.f32 %v602_v57, %v579_v61 }
 0x42b   :  { %v537_v0 = vmul.f32 %v500_v37, %v890_v5  ;;  %v630_v27 = vrot.slane %v614_v16, 5 }
 0x42c   :  { %v591_v48 = vadd.f32 %v590_v32, %v589_v55  ;;  %v596_v2 = vadd.f32 %v595_v62, %v594_v31  ;;  %v586_v4 = vadd.f32 %v585_v44, %v584_v30  ;;  %v615_v21 = vadd.f32 %v607_v52, %v894_v7 }
 0x42d   :  { %v545_v6 = vsel %vm69_vm0, %v537_v0, 0.0  ;;  %v631_v40 = vsel %vm290_vm2, %v630_v27, %v629_v8 }
 0x42e   :  { %v592_v58 = vrot.slane %v591_v48, 1  ;;  %v597_v29 = vrot.slane %v596_v2, 2  ;;  %v546_v14 = vrot.slane %v545_v6, 4  ;;  %v608_v15 = vmul.f32 %v602_v57, %v586_v4 }
 0x42f   :  { %v632_v12 = vrot.slane %v615_v21, 4 }
 0x430   :  { %v593_v17 = vadd.f32 %v592_v58, %v591_v48  ;;  %v598_v18 = vadd.f32 %v597_v29, %v596_v2  ;;  %v547_v19 = vadd.f32 %v546_v14, %v545_v6  ;;  %v616_v22 = vadd.f32 %v608_v15, %v900_v9 }
 0x431   :  { %v633_v41 = vsel %vm292_vm3, %v632_v12, %v631_v40 }
 0x432   :  { %v609_v23 = vmul.f32 %v602_v57, %v593_v17  ;;  %v599_v24 = vrot.slane %v598_v18, 1  ;;  %v548_v25 = vrot.slane %v547_v19, 2  ;;  %v634_v35 = vrot.slane %v616_v22, 3 }
 0x434   :  { %v617_v28 = vadd.f32 %v609_v23, %v904_v11  ;;  %v600_v10 = vadd.f32 %v599_v24, %v598_v18  ;;  %v549_v33 = vadd.f32 %v548_v25, %v547_v19  ;;  %v635_v42 = vsel %vm294_vm4, %v634_v35, %v633_v41 }
 0x436   :  { %v610_v36 = vmul.f32 %v602_v57, %v600_v10  ;;  %v550_v38 = vrot.slane %v549_v33, 1  ;;  %v636_v39 = vrot.slane %v617_v28, 2 }
 0x438   :  { %v551_v7 = vadd.f32 %v550_v38, %v549_v33  ;;  %v618_v9 = vadd.f32 %v610_v36, %v916_v13  ;;  %v637_v45 = vsel %vm296_vm5, %v636_v39, %v635_v42 }
 0x43a   :  { %v603_v11 = vmul.f32 %v602_v57, %v551_v7  ;;  %v638_v43 = vrot.slane %v618_v9, 1 }
 0x43c   :  { %v611_v46 = vadd.f32 %v603_v11, %v890_v5  ;;  %v639_v47 = vsel %vm298_vm6, %v638_v43, %v637_v45 }
 0x43d   :  { %645 = vst.msk [vmem:[#allocation8 + $0x1] sm:$0x7f] %vm644_vm9, %v639_v47 }
 0x43e   :  { %643 = vst.msk [vmem:[#allocation8 - $0x7] sm:$0x80] %vm642_vm10, %v611_v46 }
 0x43f   :  { %813 = shalt.err (!%p810_p6)
}
 0x440   :  { %s814_s25 = scalar_lea.hbm %s1067_s5, 128 }
 0x441   :  { %p815_p7 = scmp.ne.s32.totalorder %s1067_s5, %s814_s25  ;;  %p818_p8 = scmp.lt.u32.totalorder %s814_s25, %s1067_s5 }
 0x443   :  { %p820_p9 = pnand %p818_p8, %p815_p7 }
 0x445   :  { %823 = shalt.err (!%p820_p9)
}
 0x446   :  { %655 = dma.vmem_to_hbm [thread:$0]  %s653_s21, 128, %s1067_s5, [#allocation5]  }
 0x447   :  { %828 = dma.done.wait [#allocation5], 128  }
 0x448   :  { %829 = vsyncadd [#allocation5], 4294967168 }
 0x449   :  { %659 = vsyncpa [#allocation4], 1 }
 0x44a   :  { %660 = vsyncpa [#allocation7], 1 }
 0x44b   :  { %661 = vsyncpa [#allocation5], 1 }

</bundles_post_ra>
